<compile_context>
chip_gen: v7x
topology: tpu7x:2x2x1
jax: 0.10.0
libtpu: 0.0.40
codegen_flags: <defaults>
</compile_context>

<pallas_src>
import jax
import jax.numpy as jnp
from jax.experimental import pallas as pl
from jax.experimental.pallas import tpu as pltpu

DENSE = 16        # dense_neurons
DENSE_E = 32      # dense_neurons_E
DECAY = 10        # netDecay_neurons
RY = 0.0          # params['Ry']
RZ = 0.0          # params['Rz']
P_SYM = 1.0       # params['inversion_symmetry']

# Optional: evaluate tanh/exp in bf16 on v6e/v7x (~2x EUP throughput).  Keep
# False for f32 accuracy and on v5e (no bf16 EUP/VPU path).
USE_BF16_TRANSCENDENTALS = False

# ---------------------------------------------------------------------------
# Packed-weight layout: every weight/bias lives in one (32, 128) f32 tile that
# is DMA'd once and stays resident in VMEM (constant index_map).  Column
# offsets below; all sub-blocks start at row 0.
# ---------------------------------------------------------------------------
_C_WE2 = 0      # (32, 32)  Lin_E2.weight
_C_WH2 = 32     # (16, 16)  Lin_H2.weight
_C_WEO = 48     # (1, 32)   Lin_Eout.weight
_C_WOUT = 80    # (1, 16)   Lin_out.weight
_C_WD = 96      # (1, 10)   netDecay.weight
_C_WH1 = 106    # (16, 2)   Lin_H1.weight
_C_WE1 = 108    # (32, 1)   Lin_E1.weight
_C_BE1 = 109    # (32, 1)   Lin_E1.bias
_C_BE2 = 110    # (32, 1)   Lin_E2.bias
_C_BH1 = 111    # (16, 1)   Lin_H1.bias
_C_BH2 = 112    # (16, 1)   Lin_H2.bias
_C_WDL = 113    # (10, 1)   netDecayL.weight
_C_BDL = 114    # (10, 1)   netDecayL.bias
_C_BEO = 115    # (1, 1)    Lin_Eout.bias
_C_BOUT = 116   # (1, 1)    Lin_out.bias
_C_BD = 117     # (1, 1)    netDecay.bias
_PACK_SHAPE = (32, 128)


def _sig(v):
    """sigmoid(v) = 0.5 * (tanh(v/2) + 1): a single EUP op per element."""
    if USE_BF16_TRANSCENDENTALS:
        t = jnp.tanh((0.5 * v).astype(jnp.bfloat16)).astype(jnp.float32)
    else:
        t = jnp.tanh(0.5 * v)
    return 0.5 * (t + 1.0)


def _exp_neg(r):
    if USE_BF16_TRANSCENDENTALS:
        return jnp.exp((-r).astype(jnp.bfloat16)).astype(jnp.float32)
    return jnp.exp(-r)


def nn_atom_kernel(inp_ref, w_ref, out_ref):
    # inp_ref: (4, TN) rows x, y, z, R;  w_ref: (32, 128);  out_ref: (2, TN).
    xv = inp_ref[0:1, :]
    yv = inp_ref[1:2, :]
    zv = inp_ref[2:3, :]
    Rv = inp_ref[3:4, :]
    tn = xv.shape[1]

    # ----- unpack weights (static slices of the single resident weight tile) -----
    wE2 = w_ref[:, _C_WE2:_C_WE2 + 32]            # (32, 32)
    wH2 = w_ref[0:16, _C_WH2:_C_WH2 + 16]         # (16, 16)
    wEo = w_ref[0:1, _C_WEO:_C_WEO + 32]          # (1, 32)
    wOut = w_ref[0:1, _C_WOUT:_C_WOUT + 16]       # (1, 16)
    wD = w_ref[0:1, _C_WD:_C_WD + 10]             # (1, 10)
    wH1a = w_ref[0:16, _C_WH1:_C_WH1 + 1]         # (16, 1)
    wH1b = w_ref[0:16, _C_WH1 + 1:_C_WH1 + 2]     # (16, 1)
    wE1 = w_ref[:, _C_WE1:_C_WE1 + 1]             # (32, 1)
    bE1 = w_ref[:, _C_BE1:_C_BE1 + 1]             # (32, 1)
    bE2 = w_ref[:, _C_BE2:_C_BE2 + 1]             # (32, 1)
    bH1 = w_ref[0:16, _C_BH1:_C_BH1 + 1]          # (16, 1)
    bH2 = w_ref[0:16, _C_BH2:_C_BH2 + 1]          # (16, 1)
    wDL = w_ref[0:10, _C_WDL:_C_WDL + 1]          # (10, 1)
    bDL = w_ref[0:10, _C_BDL:_C_BDL + 1]          # (10, 1)
    bEo = w_ref[0:1, _C_BEO:_C_BEO + 1]           # (1, 1)
    bOut = w_ref[0:1, _C_BOUT:_C_BOUT + 1]        # (1, 1)
    bD = w_ref[0:1, _C_BD:_C_BD + 1]              # (1, 1)

    # ----- Energy branch: Lin_E1 -> sig -> Lin_E2 -> sig -> Lin_Eout -----
    # Lin_E1 has K=1, so it is a broadcast multiply, not a matmul.
    e = _sig(wE1 * Rv + bE1)                                                  # (32, TN)
    e = _sig(jnp.dot(wE2, e, preferred_element_type=jnp.float32) + bE2)       # (32, TN)
    E = jnp.dot(wEo, e, preferred_element_type=jnp.float32) + bEo             # (1, TN)

    # ----- atomicUnit(x, y, z, R) and atomicUnit(-x, y, z, R) -----
    # NOTE: r2 uses (y + Ry, z + Rz) exactly as in the PyTorch model.
    y1 = yv - RY
    z1 = zv - RZ
    y2 = yv + RY
    z2 = zv + RZ
    yz1 = y1 * y1 + z1 * z1
    yz2 = y2 * y2 + z2 * z2

    def atomic(xx):
        a1 = xx - Rv
        a2 = xx + Rv
        r1 = jnp.sqrt(a1 * a1 + yz1)
        r2 = jnp.sqrt(a2 * a2 + yz2)
        return _exp_neg(r1), _exp_neg(r2)

    fi_r1, fi_r2 = atomic(xv)
    if RY == 0.0 and RZ == 0.0:
        # With Ry = Rz = 0: r1(-x) == r2(x) and r2(-x) == r1(x), so the second
        # atomicUnit evaluation is redundant (saves 2 sqrt + 2 exp on the EUP).
        fi_r1m, fi_r2m = fi_r2, fi_r1
    else:
        fi_r1m, fi_r2m = atomic(-xv)

    # LCAO solution
    n_lcao = fi_r1 + P_SYM * fi_r2                                            # (1, TN)

    # ----- base(): the two calls are fused by stacking along the batch (lane)
    # axis -> half the number of small MXU dots. -----
    a_cat = jnp.concatenate([fi_r1, fi_r1m], axis=1)                          # (1, 2TN)
    b_cat = jnp.concatenate([fi_r2, fi_r2m], axis=1)                          # (1, 2TN)
    # Lin_H1 has K=2: broadcast multiply-add instead of a matmul.
    h = _sig(wH1a * a_cat + wH1b * b_cat + bH1)                               # (16, 2TN)
    h = _sig(jnp.dot(wH2, h, preferred_element_type=jnp.float32) + bH2)       # (16, 2TN)
    B = h[:, :tn] + P_SYM * h[:, tn:]                                         # (16, TN)
    NN = jnp.dot(wOut, B, preferred_element_type=jnp.float32) + bOut          # (1, TN)

    # ----- decay net: netDecayL -> sig -> netDecay -----
    f = _sig(wDL * Rv + bDL)                                                  # (10, TN)
    f = jnp.dot(wD, f, preferred_element_type=jnp.float32) + bD               # (1, TN)

    # Lane-dense stores, one row each (no sublane concat needed).
    out_ref[0:1, :] = NN * f + n_lcao
    out_ref[1:2, :] = E


def _round_up(n, m):
    return ((n + m - 1) // m) * m


def pack_params(params):
    """Pack the 16 (out,in)/(out,1) params into one (32, 128) f32 tile."""
    (wE1, bE1, wE2, bE2, wEo, bEo,
     wH1, bH1, wH2, bH2, wOut, bOut,
     wDL, bDL, wD, bD) = params
    pk = jnp.zeros(_PACK_SHAPE, jnp.float32)
    pk = pk.at[0:32, _C_WE2:_C_WE2 + 32].set(wE2.astype(jnp.float32))
    pk = pk.at[0:16, _C_WH2:_C_WH2 + 16].set(wH2.astype(jnp.float32))
    pk = pk.at[0:1, _C_WEO:_C_WEO + 32].set(wEo.astype(jnp.float32))
    pk = pk.at[0:1, _C_WOUT:_C_WOUT + 16].set(wOut.astype(jnp.float32))
    pk = pk.at[0:1, _C_WD:_C_WD + 10].set(wD.astype(jnp.float32))
    pk = pk.at[0:16, _C_WH1:_C_WH1 + 2].set(wH1.astype(jnp.float32))
    pk = pk.at[0:32, _C_WE1:_C_WE1 + 1].set(wE1.astype(jnp.float32))
    pk = pk.at[0:32, _C_BE1:_C_BE1 + 1].set(bE1.astype(jnp.float32))
    pk = pk.at[0:32, _C_BE2:_C_BE2 + 1].set(bE2.astype(jnp.float32))
    pk = pk.at[0:16, _C_BH1:_C_BH1 + 1].set(bH1.astype(jnp.float32))
    pk = pk.at[0:16, _C_BH2:_C_BH2 + 1].set(bH2.astype(jnp.float32))
    pk = pk.at[0:10, _C_WDL:_C_WDL + 1].set(wDL.astype(jnp.float32))
    pk = pk.at[0:10, _C_BDL:_C_BDL + 1].set(bDL.astype(jnp.float32))
    pk = pk.at[0:1, _C_BEO:_C_BEO + 1].set(bEo.astype(jnp.float32))
    pk = pk.at[0:1, _C_BOUT:_C_BOUT + 1].set(bOut.astype(jnp.float32))
    pk = pk.at[0:1, _C_BD:_C_BD + 1].set(bD.astype(jnp.float32))
    return pk


def nn_atom_forward(x, y, z, R, params, *, tn=8192):
    """x, y, z, R: (N, 1) float32.  Returns (Nout, E), each (N, 1) float32.

    tn = batch elements per grid step (lane tile).  Large tiles amortize the
    ~0.35 us per-step overhead; the pipelined working set (4xTN in, 2xTN out,
    spilled (32,TN)/(16,2TN) intermediates) stays well under a few MiB even at
    tn = 8192, comfortably within scoped VMEM on v5e/v6e/v7x.  tn is capped so
    the 1-D grid has >= 2 steps whenever the batch spans more than one lane
    tile, letting the "parallel" axis shard across both v7x TensorCores.
    """
    N = x.shape[0]

    # Pack the four (N, 1) inputs into a single lane-dense (4, N) array
    # (1 input DMA stream + 1 resident weight tile instead of 20 streams).
    inp = jnp.concatenate([x, y, z, R], axis=1).astype(jnp.float32).T         # (4, N)

    n128 = _round_up(N, 128)
    half = _round_up(pl.cdiv(n128, 2), 128)     # >= 2 grid steps when possible
    tn = max(128, min(tn, half))
    n_pad = _round_up(N, tn)
    if n_pad != N:
        inp = jnp.pad(inp, ((0, 0), (0, n_pad - N)))   # zero pad -> finite lanes

    pk = pack_params(params)

    fn = pl.pallas_call(
        nn_atom_kernel,
        out_shape=jax.ShapeDtypeStruct((2, n_pad), jnp.float32),
        grid_spec=pltpu.PrefetchScalarGridSpec(
            num_scalar_prefetch=0,
            grid=(n_pad // tn,),
            in_specs=[
                pl.BlockSpec((4, tn), lambda i: (0, i)),
                # Constant index map -> weight tile DMA'd once, stays resident.
                pl.BlockSpec(_PACK_SHAPE, lambda i: (0, 0)),
            ],
            out_specs=pl.BlockSpec((2, tn), lambda i: (0, i)),
        ),
        compiler_params=pltpu.CompilerParams(
            dimension_semantics=("parallel",)),
    )
    out = fn(inp, pk)                                                         # (2, n_pad)

    nout = out[0, :N].reshape(N, 1)
    E = out[1, :N].reshape(N, 1)
    return nout, E


def init_params(key):
    """Deterministic init.  Weights (out, in) like PyTorch; biases (out, 1)."""
    ks = jax.random.split(key, 16)

    def lin(kw, kb, fan_in, fan_out):
        bound = 1.0 / jnp.sqrt(fan_in)
        w = jax.random.uniform(kw, (fan_out, fan_in), jnp.float32, -bound, bound)
        b = jax.random.uniform(kb, (fan_out, 1), jnp.float32, -bound, bound)
        return w, b

    wE1, bE1 = lin(ks[0], ks[1], 1, DENSE_E)
    wE2, bE2 = lin(ks[2], ks[3], DENSE_E, DENSE_E)
    wEo, bEo = lin(ks[4], ks[5], DENSE_E, 1)
    bEo = bEo.at[0, 0].set(-1.0)          # nn.init.constant_(Lin_Eout.bias[0], -1)
    wH1, bH1 = lin(ks[6], ks[7], 2, DENSE)
    wH2, bH2 = lin(ks[8], ks[9], DENSE, DENSE)
    wOut, bOut = lin(ks[10], ks[11], DENSE, 1)
    wDL, bDL = lin(ks[12], ks[13], 1, DECAY)
    wD, bD = lin(ks[14], ks[15], DECAY, 1)

    return (wE1, bE1, wE2, bE2, wEo, bEo,
            wH1, bH1, wH2, bH2, wOut, bOut,
            wDL, bDL, wD, bD)


def reference_forward(x, y, z, R, params):
    """Plain-JAX reference mirroring the PyTorch forward (exact sigmoid)."""
    (wE1, bE1, wE2, bE2, wEo, bEo,
     wH1, bH1, wH2, bH2, wOut, bOut,
     wDL, bDL, wD, bD) = params
    sig = jax.nn.sigmoid

    def lin(w, b, v):                       # v is batch-major (N, in)
        return v @ w.T + b.T

    e = sig(lin(wE1, bE1, R))
    e = sig(lin(wE2, bE2, e))
    E = lin(wEo, bEo, e)

    def atomic(xx):
        rv1 = jnp.concatenate([xx - R, y - RY, z - RZ], axis=1)
        rv2 = jnp.concatenate([xx + R, y + RY, z + RZ], axis=1)
        r1 = jnp.sqrt(jnp.sum(rv1 ** 2, axis=1, keepdims=True))
        r2 = jnp.sqrt(jnp.sum(rv2 ** 2, axis=1, keepdims=True))
        return jnp.exp(-r1), jnp.exp(-r2)

    fi1, fi2 = atomic(x)
    fi1m, fi2m = atomic(-x)
    n_lcao = fi1 + P_SYM * fi2

    def base(a, b):
        h = sig(lin(wH1, bH1, jnp.concatenate([a, b], axis=1)))
        return sig(lin(wH2, bH2, h))

    B = base(fi1, fi2) + P_SYM * base(fi1m, fi2m)
    NN = lin(wOut, bOut, B)
    f = sig(lin(wDL, bDL, R))
    f = lin(wD, bD, f)
    return NN * f + n_lcao, E


# TODO(synk): training-side pieces of the PyTorch module (autograd Hamiltonian /
# laplacian, LossFunctions, freeze*/save/load, and the stray print in
# atomicUnit) are outside the forward pass and not translated.

if __name__ == "__main__":
    key = jax.random.PRNGKey(0)
    kp, kx, ky, kz, kr = jax.random.split(key, 5)

    N = 400   # not a multiple of 128 -> exercises lane padding + multi-step grid
    x = jax.random.uniform(kx, (N, 1), jnp.float32, -18.0, 18.0)
    y = jax.random.uniform(ky, (N, 1), jnp.float32, -18.0, 18.0)
    z = jax.random.uniform(kz, (N, 1), jnp.float32, -18.0, 18.0)
    R = jax.random.uniform(kr, (N, 1), jnp.float32, 0.2, 4.0)

    params = init_params(kp)

    # Default tn auto-caps to 256 here (grid of 2 steps) to exercise the
    # multi-step / padding path; production batches use large lane tiles.
    nout, E = nn_atom_forward(x, y, z, R, params)
    jax.block_until_ready((nout, E))

    nout_ref, E_ref = reference_forward(x, y, z, R, params)
    # tanh-based sigmoid is mathematically exact; tolerance covers f32 + HW
    # transcendental rounding (kernel is f32 vs the f64 PyTorch original).
    assert jnp.allclose(nout, nout_ref, atol=2e-2, rtol=2e-2), \
        float(jnp.max(jnp.abs(nout - nout_ref)))
    assert jnp.allclose(E, E_ref, atol=2e-2, rtol=2e-2), \
        float(jnp.max(jnp.abs(E - E_ref)))

    print("KERNEL_OK")
</pallas_src>

<mosaic_0001>
module attributes {stable_mosaic.version = 11 : i64} {
  func.func @nn_atom_kernel(%arg0: i32, %arg1: memref<4x256xf32, #tpu.memory_space<vmem>>, %arg2: memref<32x128xf32, #tpu.memory_space<vmem>>, %arg3: memref<2x256xf32, #tpu.memory_space<vmem>>) attributes {dimension_semantics = [#tpu.dimension_semantics<parallel>], iteration_bounds = array<i64: 2>, scalar_prefetch = 0 : i64, scratch_operands = 0 : i64, tpu.core_type = #tpu.core_type<tc>, window_params = [{transform_indices = @transform_0, window_bounds = array<i64: 4, 256>}, {pipeline_mode = #tpu.pipeline_mode<synchronous>, transform_indices = @transform_1, window_bounds = array<i64: 32, 128>}, {transform_indices = @transform_2, window_bounds = array<i64: 2, 256>}]} {
    %c0 = arith.constant 0 : index
    %c0_0 = arith.constant 0 : index
    %0 = vector.load %arg1[%c0, %c0_0] : memref<4x256xf32, #tpu.memory_space<vmem>>, vector<1x256xf32>
    %c1 = arith.constant 1 : index
    %c0_1 = arith.constant 0 : index
    %1 = vector.load %arg1[%c1, %c0_1] : memref<4x256xf32, #tpu.memory_space<vmem>>, vector<1x256xf32>
    %c2 = arith.constant 2 : index
    %c0_2 = arith.constant 0 : index
    %2 = vector.load %arg1[%c2, %c0_2] : memref<4x256xf32, #tpu.memory_space<vmem>>, vector<1x256xf32>
    %c3 = arith.constant 3 : index
    %c0_3 = arith.constant 0 : index
    %3 = vector.load %arg1[%c3, %c0_3] : memref<4x256xf32, #tpu.memory_space<vmem>>, vector<1x256xf32>
    %c0_4 = arith.constant 0 : index
    %c0_5 = arith.constant 0 : index
    %4 = vector.load %arg2[%c0_4, %c0_5] : memref<32x128xf32, #tpu.memory_space<vmem>>, vector<32x32xf32>
    %c0_6 = arith.constant 0 : index
    %c32 = arith.constant 32 : index
    %5 = vector.load %arg2[%c0_6, %c32] : memref<32x128xf32, #tpu.memory_space<vmem>>, vector<16x16xf32>
    %c0_7 = arith.constant 0 : index
    %c48 = arith.constant 48 : index
    %6 = vector.load %arg2[%c0_7, %c48] : memref<32x128xf32, #tpu.memory_space<vmem>>, vector<1x32xf32>
    %c0_8 = arith.constant 0 : index
    %c80 = arith.constant 80 : index
    %7 = vector.load %arg2[%c0_8, %c80] : memref<32x128xf32, #tpu.memory_space<vmem>>, vector<1x16xf32>
    %c0_9 = arith.constant 0 : index
    %c96 = arith.constant 96 : index
    %8 = vector.load %arg2[%c0_9, %c96] : memref<32x128xf32, #tpu.memory_space<vmem>>, vector<1x10xf32>
    %c0_10 = arith.constant 0 : index
    %c106 = arith.constant 106 : index
    %9 = vector.load %arg2[%c0_10, %c106] : memref<32x128xf32, #tpu.memory_space<vmem>>, vector<16x1xf32>
    %c0_11 = arith.constant 0 : index
    %c107 = arith.constant 107 : index
    %10 = vector.load %arg2[%c0_11, %c107] : memref<32x128xf32, #tpu.memory_space<vmem>>, vector<16x1xf32>
    %c0_12 = arith.constant 0 : index
    %c108 = arith.constant 108 : index
    %11 = vector.load %arg2[%c0_12, %c108] : memref<32x128xf32, #tpu.memory_space<vmem>>, vector<32x1xf32>
    %c0_13 = arith.constant 0 : index
    %c109 = arith.constant 109 : index
    %12 = vector.load %arg2[%c0_13, %c109] : memref<32x128xf32, #tpu.memory_space<vmem>>, vector<32x1xf32>
    %c0_14 = arith.constant 0 : index
    %c110 = arith.constant 110 : index
    %13 = vector.load %arg2[%c0_14, %c110] : memref<32x128xf32, #tpu.memory_space<vmem>>, vector<32x1xf32>
    %c0_15 = arith.constant 0 : index
    %c111 = arith.constant 111 : index
    %14 = vector.load %arg2[%c0_15, %c111] : memref<32x128xf32, #tpu.memory_space<vmem>>, vector<16x1xf32>
    %c0_16 = arith.constant 0 : index
    %c112 = arith.constant 112 : index
    %15 = vector.load %arg2[%c0_16, %c112] : memref<32x128xf32, #tpu.memory_space<vmem>>, vector<16x1xf32>
    %c0_17 = arith.constant 0 : index
    %c113 = arith.constant 113 : index
    %16 = vector.load %arg2[%c0_17, %c113] : memref<32x128xf32, #tpu.memory_space<vmem>>, vector<10x1xf32>
    %c0_18 = arith.constant 0 : index
    %c114 = arith.constant 114 : index
    %17 = vector.load %arg2[%c0_18, %c114] : memref<32x128xf32, #tpu.memory_space<vmem>>, vector<10x1xf32>
    %c0_19 = arith.constant 0 : index
    %c115 = arith.constant 115 : index
    %18 = vector.load %arg2[%c0_19, %c115] : memref<32x128xf32, #tpu.memory_space<vmem>>, vector<1x1xf32>
    %c0_20 = arith.constant 0 : index
    %c116 = arith.constant 116 : index
    %19 = vector.load %arg2[%c0_20, %c116] : memref<32x128xf32, #tpu.memory_space<vmem>>, vector<1x1xf32>
    %c0_21 = arith.constant 0 : index
    %c117 = arith.constant 117 : index
    %20 = vector.load %arg2[%c0_21, %c117] : memref<32x128xf32, #tpu.memory_space<vmem>>, vector<1x1xf32>
    %21 = vector.broadcast %11 : vector<32x1xf32> to vector<32x256xf32>
    %22 = vector.broadcast %3 : vector<1x256xf32> to vector<32x256xf32>
    %23 = arith.mulf %21, %22 : vector<32x256xf32>
    %24 = vector.broadcast %12 : vector<32x1xf32> to vector<32x256xf32>
    %25 = arith.addf %23, %24 : vector<32x256xf32>
    %cst = arith.constant 5.000000e-01 : f32
    %26 = vector.broadcast %cst : f32 to vector<32x256xf32>
    %27 = arith.mulf %26, %25 : vector<32x256xf32>
    %28 = math.tanh %27 : vector<32x256xf32>
    %cst_22 = arith.constant 1.000000e+00 : f32
    %29 = vector.broadcast %cst_22 : f32 to vector<32x256xf32>
    %30 = arith.addf %28, %29 : vector<32x256xf32>
    %cst_23 = arith.constant 5.000000e-01 : f32
    %31 = vector.broadcast %cst_23 : f32 to vector<32x256xf32>
    %32 = arith.mulf %31, %30 : vector<32x256xf32>
    %cst_24 = arith.constant dense<0.000000e+00> : vector<32x256xf32>
    %33 = tpu.matmul %4, %32, %cst_24 {dimension_numbers = #tpu.dot_dimension_numbers<[1], [0], [0], [1], [0, 0, 1, 1], [], []>} : vector<32x32xf32>, vector<32x256xf32>, vector<32x256xf32> -> vector<32x256xf32>
    %34 = vector.broadcast %13 : vector<32x1xf32> to vector<32x256xf32>
    %35 = arith.addf %33, %34 : vector<32x256xf32>
    %cst_25 = arith.constant 5.000000e-01 : f32
    %36 = vector.broadcast %cst_25 : f32 to vector<32x256xf32>
    %37 = arith.mulf %36, %35 : vector<32x256xf32>
    %38 = math.tanh %37 : vector<32x256xf32>
    %cst_26 = arith.constant 1.000000e+00 : f32
    %39 = vector.broadcast %cst_26 : f32 to vector<32x256xf32>
    %40 = arith.addf %38, %39 : vector<32x256xf32>
    %cst_27 = arith.constant 5.000000e-01 : f32
    %41 = vector.broadcast %cst_27 : f32 to vector<32x256xf32>
    %42 = arith.mulf %41, %40 : vector<32x256xf32>
    %cst_28 = arith.constant dense<0.000000e+00> : vector<1x256xf32>
    %43 = tpu.matmul %6, %42, %cst_28 {dimension_numbers = #tpu.dot_dimension_numbers<[1], [0], [0], [1], [0, 0, 1, 1], [], []>} : vector<1x32xf32>, vector<32x256xf32>, vector<1x256xf32> -> vector<1x256xf32>
    %44 = vector.broadcast %18 : vector<1x1xf32> to vector<1x256xf32>
    %45 = arith.addf %43, %44 : vector<1x256xf32>
    %cst_29 = arith.constant 0.000000e+00 : f32
    %46 = vector.broadcast %cst_29 : f32 to vector<1x256xf32>
    %47 = arith.subf %1, %46 : vector<1x256xf32>
    %cst_30 = arith.constant 0.000000e+00 : f32
    %48 = vector.broadcast %cst_30 : f32 to vector<1x256xf32>
    %49 = arith.subf %2, %48 : vector<1x256xf32>
    %cst_31 = arith.constant 0.000000e+00 : f32
    %50 = vector.broadcast %cst_31 : f32 to vector<1x256xf32>
    %51 = arith.addf %1, %50 : vector<1x256xf32>
    %cst_32 = arith.constant 0.000000e+00 : f32
    %52 = vector.broadcast %cst_32 : f32 to vector<1x256xf32>
    %53 = arith.addf %2, %52 : vector<1x256xf32>
    %54 = arith.mulf %47, %47 : vector<1x256xf32>
    %55 = arith.mulf %49, %49 : vector<1x256xf32>
    %56 = arith.addf %54, %55 : vector<1x256xf32>
    %57 = arith.mulf %51, %51 : vector<1x256xf32>
    %58 = arith.mulf %53, %53 : vector<1x256xf32>
    %59 = arith.addf %57, %58 : vector<1x256xf32>
    %60 = arith.subf %0, %3 : vector<1x256xf32>
    %61 = arith.addf %0, %3 : vector<1x256xf32>
    %62 = arith.mulf %60, %60 : vector<1x256xf32>
    %63 = arith.addf %62, %56 : vector<1x256xf32>
    %64 = math.sqrt %63 : vector<1x256xf32>
    %65 = arith.mulf %61, %61 : vector<1x256xf32>
    %66 = arith.addf %65, %59 : vector<1x256xf32>
    %67 = math.sqrt %66 : vector<1x256xf32>
    %cst_33 = arith.constant 0.000000e+00 : f32
    %68 = vector.broadcast %cst_33 : f32 to vector<1x256xf32>
    %69 = arith.subf %68, %64 : vector<1x256xf32>
    %70 = math.exp %69 : vector<1x256xf32>
    %cst_34 = arith.constant 0.000000e+00 : f32
    %71 = vector.broadcast %cst_34 : f32 to vector<1x256xf32>
    %72 = arith.subf %71, %67 : vector<1x256xf32>
    %73 = math.exp %72 : vector<1x256xf32>
    %cst_35 = arith.constant 1.000000e+00 : f32
    %74 = vector.broadcast %cst_35 : f32 to vector<1x256xf32>
    %75 = arith.mulf %74, %73 : vector<1x256xf32>
    %76 = arith.addf %70, %75 : vector<1x256xf32>
    %77 = tpu.concatenate %70, %73 in 1 : vector<1x256xf32>, vector<1x256xf32> -> vector<1x512xf32>
    %78 = tpu.concatenate %73, %70 in 1 : vector<1x256xf32>, vector<1x256xf32> -> vector<1x512xf32>
    %79 = vector.broadcast %9 : vector<16x1xf32> to vector<16x512xf32>
    %80 = vector.broadcast %77 : vector<1x512xf32> to vector<16x512xf32>
    %81 = arith.mulf %79, %80 : vector<16x512xf32>
    %82 = vector.broadcast %10 : vector<16x1xf32> to vector<16x512xf32>
    %83 = vector.broadcast %78 : vector<1x512xf32> to vector<16x512xf32>
    %84 = arith.mulf %82, %83 : vector<16x512xf32>
    %85 = arith.addf %81, %84 : vector<16x512xf32>
    %86 = vector.broadcast %14 : vector<16x1xf32> to vector<16x512xf32>
    %87 = arith.addf %85, %86 : vector<16x512xf32>
    %cst_36 = arith.constant 5.000000e-01 : f32
    %88 = vector.broadcast %cst_36 : f32 to vector<16x512xf32>
    %89 = arith.mulf %88, %87 : vector<16x512xf32>
    %90 = math.tanh %89 : vector<16x512xf32>
    %cst_37 = arith.constant 1.000000e+00 : f32
    %91 = vector.broadcast %cst_37 : f32 to vector<16x512xf32>
    %92 = arith.addf %90, %91 : vector<16x512xf32>
    %cst_38 = arith.constant 5.000000e-01 : f32
    %93 = vector.broadcast %cst_38 : f32 to vector<16x512xf32>
    %94 = arith.mulf %93, %92 : vector<16x512xf32>
    %cst_39 = arith.constant dense<0.000000e+00> : vector<16x512xf32>
    %95 = tpu.matmul %5, %94, %cst_39 {dimension_numbers = #tpu.dot_dimension_numbers<[1], [0], [0], [1], [0, 0, 1, 1], [], []>} : vector<16x16xf32>, vector<16x512xf32>, vector<16x512xf32> -> vector<16x512xf32>
    %96 = vector.broadcast %15 : vector<16x1xf32> to vector<16x512xf32>
    %97 = arith.addf %95, %96 : vector<16x512xf32>
    %cst_40 = arith.constant 5.000000e-01 : f32
    %98 = vector.broadcast %cst_40 : f32 to vector<16x512xf32>
    %99 = arith.mulf %98, %97 : vector<16x512xf32>
    %100 = math.tanh %99 : vector<16x512xf32>
    %cst_41 = arith.constant 1.000000e+00 : f32
    %101 = vector.broadcast %cst_41 : f32 to vector<16x512xf32>
    %102 = arith.addf %100, %101 : vector<16x512xf32>
    %cst_42 = arith.constant 5.000000e-01 : f32
    %103 = vector.broadcast %cst_42 : f32 to vector<16x512xf32>
    %104 = arith.mulf %103, %102 : vector<16x512xf32>
    %105 = vector.extract_strided_slice %104 {offsets = [0, 0], sizes = [16, 256], strides = [1, 1]} : vector<16x512xf32> to vector<16x256xf32>
    %106 = vector.extract_strided_slice %104 {offsets = [0, 256], sizes = [16, 256], strides = [1, 1]} : vector<16x512xf32> to vector<16x256xf32>
    %cst_43 = arith.constant 1.000000e+00 : f32
    %107 = vector.broadcast %cst_43 : f32 to vector<16x256xf32>
    %108 = arith.mulf %107, %106 : vector<16x256xf32>
    %109 = arith.addf %105, %108 : vector<16x256xf32>
    %cst_44 = arith.constant dense<0.000000e+00> : vector<1x256xf32>
    %110 = tpu.matmul %7, %109, %cst_44 {dimension_numbers = #tpu.dot_dimension_numbers<[1], [0], [0], [1], [0, 0, 1, 1], [], []>} : vector<1x16xf32>, vector<16x256xf32>, vector<1x256xf32> -> vector<1x256xf32>
    %111 = vector.broadcast %19 : vector<1x1xf32> to vector<1x256xf32>
    %112 = arith.addf %110, %111 : vector<1x256xf32>
    %113 = vector.broadcast %16 : vector<10x1xf32> to vector<10x256xf32>
    %114 = vector.broadcast %3 : vector<1x256xf32> to vector<10x256xf32>
    %115 = arith.mulf %113, %114 : vector<10x256xf32>
    %116 = vector.broadcast %17 : vector<10x1xf32> to vector<10x256xf32>
    %117 = arith.addf %115, %116 : vector<10x256xf32>
    %cst_45 = arith.constant 5.000000e-01 : f32
    %118 = vector.broadcast %cst_45 : f32 to vector<10x256xf32>
    %119 = arith.mulf %118, %117 : vector<10x256xf32>
    %120 = math.tanh %119 : vector<10x256xf32>
    %cst_46 = arith.constant 1.000000e+00 : f32
    %121 = vector.broadcast %cst_46 : f32 to vector<10x256xf32>
    %122 = arith.addf %120, %121 : vector<10x256xf32>
    %cst_47 = arith.constant 5.000000e-01 : f32
    %123 = vector.broadcast %cst_47 : f32 to vector<10x256xf32>
    %124 = arith.mulf %123, %122 : vector<10x256xf32>
    %cst_48 = arith.constant dense<0.000000e+00> : vector<1x256xf32>
    %125 = tpu.matmul %8, %124, %cst_48 {dimension_numbers = #tpu.dot_dimension_numbers<[1], [0], [0], [1], [0, 0, 1, 1], [], []>} : vector<1x10xf32>, vector<10x256xf32>, vector<1x256xf32> -> vector<1x256xf32>
    %126 = vector.broadcast %20 : vector<1x1xf32> to vector<1x256xf32>
    %127 = arith.addf %125, %126 : vector<1x256xf32>
    %128 = arith.mulf %112, %127 : vector<1x256xf32>
    %129 = arith.addf %128, %76 : vector<1x256xf32>
    %c0_49 = arith.constant 0 : index
    %c0_50 = arith.constant 0 : index
    %130 = vector.load %arg3[%c0_49, %c0_50] : memref<2x256xf32, #tpu.memory_space<vmem>>, vector<1x256xf32>
    tpu.vector_store %arg3[%c0_49, %c0_50], %129 {strides = array<i32>} : memref<2x256xf32, #tpu.memory_space<vmem>>, vector<1x256xf32>,
    %c1_51 = arith.constant 1 : index
    %c0_52 = arith.constant 0 : index
    %131 = vector.load %arg3[%c1_51, %c0_52] : memref<2x256xf32, #tpu.memory_space<vmem>>, vector<1x256xf32>
    tpu.vector_store %arg3[%c1_51, %c0_52], %45 {strides = array<i32>} : memref<2x256xf32, #tpu.memory_space<vmem>>, vector<1x256xf32>,
    return
  }
  func.func @transform_0(%arg0: i32) -> (i32, i32) {
    %c0_i32 = arith.constant 0 : i32
    %c0_i32_0 = arith.constant 0 : i32
    return %c0_i32, %arg0 : i32, i32
  }
  func.func @transform_1(%arg0: i32) -> (i32, i32) {
    %c0_i32 = arith.constant 0 : i32
    %c0_i32_0 = arith.constant 0 : i32
    %c0_i32_1 = arith.constant 0 : i32
    return %c0_i32, %c0_i32_0 : i32, i32
  }
  func.func @transform_2(%arg0: i32) -> (i32, i32) {
    %c0_i32 = arith.constant 0 : i32
    %c0_i32_0 = arith.constant 0 : i32
    return %c0_i32, %arg0 : i32, i32
  }
}

</mosaic_0001>

<bundles_post_ra>
// kernel: tpu_custom_call.1
= control target key start
LH: loop header
LB: loop body
LE: loop exit
PB: predicated region body
PF: predicated region fallthrough
CT: control target
= control target key end

     0   :  { %7 = vsyncpa [#allocation3], 0  ;;  %s2016_s0 = inlined_call_operand.hbm [shape: f32[4,512], index: 0, kind: input, shape index: {}]   ;;  %s2017_s1 = inlined_call_operand.hbm [shape: f32[32,128], index: 1, kind: input, shape index: {}]   ;;  %s2018_s2 = inlined_call_operand.hbm [shape: f32[2,512], index: 2, kind: output, shape index: {}]  }
   0x1   :  { %9 = vsyncpa [#allocation3 + $0x1], 0 }
   0x2   :  { %10 = vsyncpa [#allocation6], 0 }
   0x3   :  { %11 = vsyncpa [#allocation4], 0 }
   0x4   :  { %13 = vsyncpa [#allocation4 + $0x1], 0  ;;  %s1659_s9 = smov 0   ;;  %s1661_s10 = smov 0  }
   0x5   :  { %s1663_s11 = smov 0   ;;  %s1665_s12 = smov 0  }
   0x6 LB: > { %s1680_s13 = sadd.s32 4294967295, %s1618_s12   ;;  %s1243_s14 = sadd.s32 4294967294, %s1618_s12   ;;  %s1618_s12 = sphi %s1665_s12, %s2040_s12   ;;  %s1614_s11 = sphi %s1663_s11, %s2039_s11   ;;  %s1610_s10 = sphi %s1661_s10, %s2038_s10   ;;  %s1606_s9 = sphi %s1659_s9, %s2037_s9  }
   0x7   : > { %p39_p0 = scmp.ne.s32.totalorder %s1610_s10, %s1606_s9  ;;  %p2019_p1 = scmp.eq.s32.totalorder %s1680_s13, 0 }
   0x8   : > { %p90_p3 = scmp.eq.s32.totalorder %s1243_s14, 1  ;;  %p1244_p5 = scmp.ge.s32.totalorder %s1618_s12, 1 }
   0x9   : > { %p1689_p4 = por %p2019_p1, %p39_p0  ;;  %p97_p7 = scmp.lt.s32.totalorder %s1618_s12, 3 }
   0xa   : > { %p1694_p6 = por %p90_p3, %p39_p0  ;;  %s1620_s18 = smov [#allocation5]  }
   0xb   : > { %s2022_s15 = scalar_select %p1689_p4, 1, 0 }
   0xc   : > { %s2023_s16 = scalar_select %p1694_p6, 1, 0 }
   0xd   : > { %p1699_p8 = pnand %p1244_p5, %p97_p7  ;;  %s109_s19 = sshll.u32 %s1620_s18, 4  ;;  %s1703_s19 = int_to_ptr.vmem [resolvable:$true] %s109_s19 }
   0xe   : > { %s1715_s21 = sadd.s32 1, %s1618_s12   ;;  %s26_s22 = sadd.s32 1, %s1614_s11 }
   0xf   : > { %s2024_s17 = scalar_select %p1699_p8, 1, 0 }
  0x10   : > { %p1320_p9 = pneg %p1699_p8  ;;  %s23_s23 = ssub.s32 %s1618_s12, %s1715_s21 }
  0x11   : > { %s1490_s26 = scalar_lea.hbm %s2017_s1, 512 }
  0x12   : > { %p1710_p11 = pnand %p1320_p9, %p2019_p1  ;;  %p1491_p12 = scmp.ne.s32.totalorder %s2017_s1, %s1490_s26 }
  0x13   : > { %p1497_p5 = scmp.lt.u32.totalorder %s1490_s26, %s2017_s1 }
  0x14   : > { %p1492_p13 = pneg %p1710_p11 }
  0x16   : > { %p1493_p0 = pnand %p1492_p13, %p1491_p12 }
  0x18   : > { %p1494_p3 = pneg %p1493_p0 }
  0x1a   : > { %p1499_p7 = pnand %p1497_p5, %p1494_p3 }
  0x1c   : > { %1502 = shalt.err (!%p1499_p7)
}
  0x1d   : > { %s1503_s3 = scalar_lea.vmem %s1703_s19, 512  ;;  %p1511_p2 = scmp.lt.s32.totalorder %s1703_s19, %s1703_s19 }
  0x1e   : > { %p1504_p9 = scmp.ne.s32.totalorder %s1703_s19, %s1503_s3  ;;  %p1512_p6 = scmp.lt.s32.totalorder %s1503_s3, %s1503_s3 }
  0x20   : > { %p1506_p10 = pnand %p1504_p9, %p1492_p13  ;;  %p1513_p4 = por %p1512_p6, %p1511_p2 }
  0x22   : > { %p1507_p1 = pneg %p1506_p10 }
  0x24   : > { %p1514_p8 = pnand %p1513_p4, %p1507_p1 }
  0x26   : > { %1517 = shalt.err (!%p1514_p8)
}
  0x27   : > { %s1621_s4 = smov 128   ;;  %s1622_s5 = smov 8  }
  0x28   : > { %1323 = dma.hbm_to_vmem [thread:$0]  (!%p1710_p11), %s2017_s1, 512, %s1703_s19, [#allocation6], %s1621_s4, %s1621_s4, %s1622_s5  }
  0x29   : > { %p24_p2 = scmp.eq.s32.totalorder %s23_s23, 0  ;;  %p33_p1 = scmp.ne.s32.totalorder %s1614_s11, %s1610_s10 }
  0x2a   : > { %p34_p4 = scmp.eq.s32.totalorder %s1618_s12, 0  ;;  %p1333_p6 = scmp.lt.s32.totalorder %s1618_s12, 2 }
  0x2b   : > { %s1746_s8 = scalar_select %p24_p2, %s1614_s11, %s26_s22  }
  0x2c   : > { %p35_p8 = por %p34_p4, %p33_p1  ;;  %p2026_p10 = scmp.eq.s32.totalorder %s1680_s13, 1 }
  0x2d   : > { %s123_s18 = sand.u32 1, %s1614_s11   ;;  %s1276_s24 = sshll.u32 %s1618_s12, 7 }
  0x2e   : > { %p1750_p12 = por %p2026_p10, %p33_p1  ;;  %s1247_s25 = sshll.u32 %s123_s18, 3 }
  0x2f   : > { %s1759_s27 = scalar_lea.hbm %s2016_s0, %s1276_s24  ;;  %s127_s19 = scalar_lea.vmem [#allocation2], %s1247_s25 }
  0x30   : > { %s135_s22 = sshll.u32 %s127_s19, 4  ;;  %p1761_p11 = pnand %p1333_p6, %p35_p8  ;;  %s1765_s22 = int_to_ptr.vmem [resolvable:$true] %s135_s22 }
  0x31   : > { %s124_s28 = scalar_lea.sflag [#allocation3], %s123_s18  ;;  %s1518_s29 = scalar_lea.hbm %s1759_s27, 128 }
  0x32   : > { %p1519_p13 = scmp.ne.s32.totalorder %s1759_s27, %s1518_s29  ;;  %p1520_p0 = pneg %p1761_p11 }
  0x33   : > { %s1523_s4 = scalar_lea.hbm %s2016_s0, 256  ;;  %p1524_p7 = scmp.lt.u32.totalorder %s1759_s27, %s2016_s0 }
  0x34   : > { %p1521_p3 = pnand %p1520_p0, %p1519_p13  ;;  %p1525_p9 = scmp.lt.u32.totalorder %s1523_s4, %s1518_s29 }
  0x35   : > { %p1527_p1 = scmp.lt.u32.totalorder %s1518_s29, %s1759_s27 }
  0x36   : > { %p1522_p5 = pneg %p1521_p3  ;;  %p1526_p2 = por %p1525_p9, %p1524_p7 }
  0x38   : > { %p1528_p4 = por %p1527_p1, %p1526_p2 }
  0x3a   : > { %p1529_p6 = pnand %p1528_p4, %p1522_p5 }
  0x3c   : > { %1532 = shalt.err (!%p1529_p6)
}
  0x3d   : > { %s1533_s7 = scalar_lea.vmem %s1765_s22, 128  ;;  %s1623_s18 = smov [#allocation2]  }
  0x3e   : > { %p1534_p8 = scmp.ne.s32.totalorder %s1765_s22, %s1533_s7  ;;  %s1538_s24 = sshll.u32 %s1623_s18, 4  ;;  %s1539_s24 = int_to_ptr.vmem [resolvable:$false] %s1538_s24 }
  0x3f   : > { %s1540_s25 = scalar_lea.vmem %s1539_s24, 256  ;;  %p1541_p3 = scmp.lt.s32.totalorder %s1765_s22, %s1539_s24 }
  0x40   : > { %p1536_p10 = pnand %p1534_p8, %p1520_p0  ;;  %p1542_p7 = scmp.lt.s32.totalorder %s1540_s25, %s1533_s7 }
  0x42   : > { %p1537_p13 = pneg %p1536_p10  ;;  %p1543_p9 = por %p1542_p7, %p1541_p3 }
  0x44   : > { %p1544_p2 = pnand %p1543_p9, %p1537_p13 }
  0x46   : > { %1547 = shalt.err (!%p1544_p2)
}
  0x47   : > { %1327 = dma.hbm_to_vmem [thread:$0]  (!%p1761_p11), %s1759_s27, 128, %s1765_s22, %s124_s28  }
  0x48   : > { %p2029_p5 = scmp.ne.s32.totalorder %s2024_s17, 0 }
  0x49   : > { %s1795_s20 = sand.u32 (!%p2029_p5), 1, %s1610_s10   ;;  %p2030_p0 = scmp.ne.s32.totalorder (!%p2029_p5), %s2022_s15, 0 }
  0x4a   : > { %144 = sbr.rel (%p2029_p5) target bundleno = 1005 (0x3ed), region = 28  ;;  %s1251_s26 = sshll.u32 (!%p2029_p5), %s1795_s20, 3 }
  0x4b   : > { %s147_s19 = scalar_lea.sflag (!%p2029_p5), [#allocation3], %s1795_s20  ;;  %s1799_s29 = scalar_lea.vmem (!%p2029_p5), [#allocation2], %s1251_s26 }
  0x51   : > { %1593 = dma.done.wait (%p2030_p0), %s147_s19, 128  }
  0x52   : > { %1595 = vsyncadd (%p2030_p0), %s147_s19, 4294967168  ;;  %p2031_p11 = scmp.eq.s32.totalorder %s1680_s13, 0 }
  0x54   : > { %1597 = dma.done.wait (%p2031_p11), [#allocation6], 512   ;;  %p2032_p1 = pmov %p2031_p11 }
  0x55   : > { %v1624_v0 = vmov 109   ;;  %v1625_v1 = vmov 108   ;;  %v1809_v2 = vld [vmem:[#allocation5] sm:$0xff]  ;;  %v1813_v3 = vld [vmem:[#allocation5 + $0x8] sm:$0xff]  ;;  %v1817_v4 = vld [vmem:[#allocation5 + $0x10] sm:$0xff]  ;;  %v1626_v6 = vmov 0.0   ;;  %v213_v12 = vlaneseq }
  0x56   : > { %1599 = vsyncadd (%p2032_p1), [#allocation6], 4294966784  ;;  %1391 = vset.pattern.permute.xlu1 %v1624_v0  ;;  %1390 = vset.pattern.permute.xlu0 %v1625_v1  ;;  %v1819_v5 = vld [vmem:[#allocation5 + $0x18] sm:$0xff]  ;;  %v1627_v7 = vmov 110   ;;  %v1628_v8 = vmov 106   ;;  %v1629_v9 = vmov 107  }
  0x57   : > { %232 = vperm.xlu1 %1391, %v1809_v2   ;;  %194 = vperm.xlu0 %1390, %v1809_v2   ;;  %v1833_v10 = vld [vmem:[#allocation5] sm:$0x1]  ;;  %s1630_s15 = smov 80   ;;  %s1631_s17 = smov 96   ;;  %v1632_v11 = vmov 111   ;;  %v1843_v13 = vshrl.u32 %v213_v12, 7 }
  0x58   : > { %376 = vmatprep.mubr.f32.mxu0 %v1626_v6  ;;  %506 = vmatprep.mubr.f32.mxu1 %v1626_v6  ;;  %v1852_v16 = vld [vmem:[%s1799_s29 + $0x3] ss:$4 sm:$0x3]  ;;  %vm303_vm0 = vcmask 261120   ;;  %s1636_s27 = smov 32   ;;  %s1637_s22 = smov 48  }
  0x59   : > { %v1846_v14 = vsub.s32 0, %v1843_v13  ;;  %v1849_v15 = vsub.s32 1, %v1843_v13  ;;  %vm688_vm5 = vcmask 130048   ;;  %s1253_s23 = sshll.u32 %s1795_s20, 2  ;;  %vm1941_vm6 = vcmp.lt.s32.totalorder %v213_v12, 256  ;;  %s1277_s30 = sshll.u32 %s1680_s13, 6 }
  0x5a   : > { %s1947_s28 = scalar_lea.vmem [#allocation7], %s1253_s23  ;;  %vm1012_vm7 = vcmask 1041408   ;;  %vm1642_vm8 = vmmov 1   ;;  %vm1009_vm10 = vcmask 80896   ;;  %s1969_s6 = scalar_lea.hbm %s2018_s2, %s1277_s30 }
  0x5b   : > { %236 = vperm.xlu1 %1391, %v1813_v3   ;;  %199 = vperm.xlu0 %1390, %v1813_v3   ;;  %v1856_v17 = vrot.slane %v1852_v16, %v1846_v14  ;;  %v1860_v18 = vrot.slane %v1852_v16, %v1849_v15  ;;  %vm1307_vm9 = vmpackc.low %vm1012_vm7, %vm1642_vm8  ;;  %s1163_s3 = sshll.u32 %s1947_s28, 4  ;;  %s1149_s7 = scalar_lea.sflag [#allocation4], %s1795_s20  ;;  %s1971_s3 = int_to_ptr.vmem [resolvable:$true] %s1163_s3 }
  0x5c   : > { %s1548_s13 = scalar_lea.vmem %s1971_s3, 64  ;;  %s1643_s18 = smov [#allocation7]  }
  0x5d   : > { %p1549_p4 = scmp.ne.s32.totalorder %s1971_s3, %s1548_s13  ;;  %s1552_s24 = sshll.u32 %s1643_s18, 4  ;;  %s1553_s24 = int_to_ptr.vmem [resolvable:$false] %s1552_s24 }
  0x5e   : > { %s1554_s25 = scalar_lea.vmem %s1553_s24, 128  ;;  %p1555_p10 = scmp.lt.s32.totalorder %s1971_s3, %s1553_s24 }
  0x5f   : > { %1392 = vset.pattern.permute.xlu1 %v1625_v1  ;;  %204 = vperm.xlu0 %1390, %v1817_v4   ;;  %p1550_p6 = pnand %p1549_p4, %p1750_p12  ;;  %p1556_p13 = scmp.lt.s32.totalorder %s1554_s25, %s1548_s13 }
  0x60   : > { %209 = vperm.xlu1 %1392, %v1819_v5  }
  0x61   : > { %p1551_p8 = pneg %p1550_p6  ;;  %p1557_p3 = por %p1556_p13, %p1555_p10 }
  0x63   : > { %1393 = vset.pattern.permute.xlu0 %v1624_v0  ;;  %p1558_p7 = pnand %p1557_p3, %p1551_p8 }
  0x64   : > { %1394 = vset.pattern.permute.xlu1 %v1624_v0  ;;  %240 = vperm.xlu0 %1393, %v1817_v4  }
  0x65   : > { %244 = vperm.xlu1 %1394, %v1819_v5  }
  0x68   : > { %1396 = vset.pattern.permute.xlu0 %v1627_v7 }
  0x69   : > { %1395 = vset.pattern.permute.xlu1 %v1627_v7  ;;  %292 = vperm.xlu0 %1396, %v1813_v3  }
  0x6a   : > { %288 = vperm.xlu1 %1395, %v1809_v2  }
  0x6d   : > { %1397 = vset.pattern.permute.xlu0 %v1628_v8 }
  0x6e   : > { %296 = vperm.xlu1 %1395, %v1817_v4   ;;  %572 = vperm.xlu0 %1397, %v1809_v2  }
  0x72   : > { %300 = vperm.xlu1 %1395, %v1819_v5   ;;  %1400 = vset.pattern.permute.xlu0 %v1629_v9 }
  0x73   : > { %609 = vperm.xlu0 %1400, %v1813_v3  }
  0x76   : > { %1398 = vset.pattern.permute.xlu1 %v1628_v8 }
  0x77   : > { %577 = vperm.xlu1 %1398, %v1813_v3   ;;  %438 = vrot.lane.b32.xlu0 %v1833_v10, %s1630_s15 }
  0x7b   : > { %1399 = vset.pattern.permute.xlu1 %v1629_v9  ;;  %686 = vrot.lane.b32.xlu0 %v1813_v3, %s1631_s17 }
  0x7c   : > { %605 = vperm.xlu1 %1399, %v1809_v2  }
  0x80   : > { %1401 = vset.pattern.permute.xlu1 %v1632_v11 }
  0x81   : > { %629 = vperm.xlu1 %1401, %v1809_v2  }
  0x85   : > { %633 = vperm.xlu1 %1401, %v1813_v3  }
  0x89   : > { %684 = vrot.lane.b32.xlu1 %v1809_v2, %s1631_s17 }
  0xd6   : > { %v233_v19 = vpop.permute.xlu1 %232  ;;  %v195_v20 = vpop.permute.xlu0 %194 }
  0xd7   : > { %v223_v21 = vmul.f32 %v1856_v17, %v195_v20  ;;  %v224_v22 = vmul.f32 %v1860_v18, %v195_v20 }
  0xd9   : > { %v247_v23 = vadd.f32 %v233_v19, %v223_v21  ;;  %v248_v24 = vadd.f32 %v233_v19, %v224_v22 }
  0xda   : > { %v237_v25 = vpop.permute.xlu1 %236  ;;  %v200_v26 = vpop.permute.xlu0 %199 }
  0xdb   : > { %v255_v27 = vmul.f32 0.5, %v247_v23  ;;  %v256_v28 = vmul.f32 0.5, %v248_v24  ;;  %v225_v29 = vmul.f32 %v1856_v17, %v200_v26  ;;  %v226_v30 = vmul.f32 %v1860_v18, %v200_v26 }
  0xdd   : > { %1410 = vtanh.f32 %v255_v27  ;;  %v249_v31 = vadd.f32 %v237_v25, %v225_v29  ;;  %v250_v32 = vadd.f32 %v237_v25, %v226_v30  ;;  %v1254_v29 = vld [vmem:[%s1799_s29 + $0x1] ss:$4 sm:$0x3]  ;;  %v1255_v30 = vld [vmem:[%s1799_s29 + $0x2] ss:$4 sm:$0x3] }
  0xde   : > { %1412 = vtanh.f32 %v256_v28  ;;  %v205_v33 = vpop.permute.xlu0 %204  ;;  %v177_v28 = vld [vmem:[%s1799_s29] ss:$4 sm:$0x3] }
  0xdf   : > { %v257_v34 = vmul.f32 0.5, %v249_v31  ;;  %v258_v35 = vmul.f32 0.5, %v250_v32  ;;  %v210_v36 = vpop.permute.xlu1 %209  ;;  %v227_v37 = vmul.f32 %v1856_v17, %v205_v33  ;;  %v228_v38 = vmul.f32 %v1860_v18, %v205_v33 }
  0xe0   : > { %v229_v39 = vmul.f32 %v1856_v17, %v210_v36  ;;  %v230_v40 = vmul.f32 %v1860_v18, %v210_v36  ;;  %v515_v31 = vmul.f32 %v1254_v29, %v1254_v29  ;;  %v516_v32 = vmul.f32 %v1255_v30, %v1255_v30 }
  0xe1   : > { %1414 = vtanh.f32 %v257_v34  ;;  %v521_v33 = vsub.f32 %v177_v28, %v1852_v16  ;;  %v522_v34 = vadd.f32 %v1852_v16, %v177_v28 }
  0xe2   : > { %1416 = vtanh.f32 %v258_v35  ;;  %v1633_v35 = vmov 112  }
  0xe3   : > { %v241_v41 = vpop.permute.xlu0 %240  ;;  %1402 = vset.pattern.permute.xlu1 %v1633_v35  ;;  %1403 = vset.pattern.permute.xlu0 %v1633_v35  ;;  %v532_v36 = vmul.f32 %v522_v34, %v522_v34 }
  0xe4   : > { %v251_v42 = vadd.f32 %v241_v41, %v227_v37  ;;  %v252_v43 = vadd.f32 %v241_v41, %v228_v38  ;;  %v245_v44 = vpop.permute.xlu1 %244  ;;  %677 = vperm.xlu1 %1402, %v1809_v2   ;;  %681 = vperm.xlu0 %1403, %v1813_v3   ;;  %v1634_v37 = vmov 113   ;;  %v1635_v38 = vmov 114  }
  0xe5   : > { %v253_v45 = vadd.f32 %v245_v44, %v229_v39  ;;  %v254_v46 = vadd.f32 %v245_v44, %v230_v40  ;;  %v191_v40 = vld [vmem:[#allocation5 + $0x8] sm:$0x3]  ;;  %v1638_v41 = vmov 116  }
  0xe6   : > { %v259_v47 = vmul.f32 0.5, %v251_v42  ;;  %v260_v48 = vmul.f32 0.5, %v252_v43 }
  0xe7   : > { %v1411_v49 = vpop.eup %1410  ;;  %v261_v50 = vmul.f32 0.5, %v253_v45  ;;  %v262_v51 = vmul.f32 0.5, %v254_v46 }
  0xe8   : > { %v1413_v52 = vpop.eup %1412  ;;  %1418 = vtanh.f32 %v259_v47  ;;  %v271_v53 = vadd.f32 1.0, %v1411_v49  ;;  %1404 = vset.pattern.permute.xlu1 %v1634_v37  ;;  %1405 = vset.pattern.permute.xlu0 %v1635_v38  ;;  %v1639_v47 = vmov 115  }
  0xe9   : > { %1420 = vtanh.f32 %v260_v48  ;;  %v272_v55 = vadd.f32 1.0, %v1413_v52  ;;  %963 = vperm.xlu1 %1404, %v1809_v2   ;;  %976 = vperm.xlu0 %1405, %v1809_v2  }
  0xea   : > { %1422 = vtanh.f32 %v261_v50  ;;  %v279_v59 = vmul.f32 0.5, %v271_v53  ;;  %v289_v53 = vpop.permute.xlu1 %288 }
  0xeb   : > { %v1415_v54 = vpop.eup %1414  ;;  %1424 = vtanh.f32 %v262_v51  ;;  %v280_v61 = vmul.f32 0.5, %v272_v55 }
  0xec   : > { %v1417_v56 = vpop.eup %1416  ;;  %v273_v57 = vadd.f32 1.0, %v1415_v54 }
  0xed   : > { %v274_v58 = vadd.f32 1.0, %v1417_v56  ;;  %968 = vperm.xlu1 %1404, %v191_v40   ;;  %1007 = vrot.lane.b32.xlu0 %v1833_v10, %s1636_s27 }
  0xee   : > { %v281_v60 = vmul.f32 0.5, %v273_v57  ;;  %v1895_v56 = vpop.permute.xlu1 %296 }
  0xef   : > { %v282_v62 = vmul.f32 0.5, %v274_v58 }
  0xf0   : > { %v1280_v63 = vpack.c.bf16 %v281_v60, %v279_v59  ;;  %v293_v60 = vpop.permute.xlu0 %292 }
  0xf1   : > { %v1278_v0 = vpack.c.bf16 %v282_v62, %v280_v61  ;;  %1406 = vset.pattern.permute.xlu1 %v1635_v38 }
  0xf2   : > { %v1419_v1 = vpop.eup %1418  ;;  %980 = vperm.xlu1 %1406, %v191_v40   ;;  %v1897_v57 = vpop.permute.xlu1 %300 }
  0xf3   : > { %v1421_v7 = vpop.eup %1420  ;;  %v275_v8 = vadd.f32 1.0, %v1419_v1  ;;  %1279 = vmatprep.subr.bf16.mxu0 %v1278_v0 }
  0xf4   : > { %v1423_v9 = vpop.eup %1422  ;;  %v276_v11 = vadd.f32 1.0, %v1421_v7  ;;  %1281 = vmatpush1.bf16.msra.mxu0 %v1280_v63 }
  0xf5   : > { %v1425_v19 = vpop.eup %1424  ;;  %v277_v20 = vadd.f32 1.0, %v1423_v9  ;;  %v283_v21 = vmul.f32 0.5, %v275_v8  ;;  %v573_v9 = vpop.permute.xlu0 %572 }
  0xf6   : > { %v278_v22 = vadd.f32 1.0, %v1425_v19  ;;  %v284_v23 = vmul.f32 0.5, %v276_v11  ;;  %887 = vrot.lane.b32.xlu1 %v1833_v10, %s1637_s22  ;;  %v578_v61 = vpop.permute.xlu1 %577 }
  0xf7   : > { %v285_v24 = vmul.f32 0.5, %v277_v20  ;;  %1407 = vset.pattern.permute.xlu1 %v1638_v41 }
  0xf8   : > { %v286_v25 = vmul.f32 0.5, %v278_v22 }
  0xf9   : > { %v1284_v26 = vpack.c.bf16 %v285_v24, %v283_v21 }
  0xfa   : > { %v1282_v27 = vpack.c.bf16 %v286_v25, %v284_v23  ;;  %884 = vperm.xlu1 %1407, %v1833_v10   ;;  %v610_v25 = vpop.permute.xlu0 %609 }
  0xfb   : > { %v606_v20 = vpop.permute.xlu1 %605 }
  0xfc   : > { %1283 = vmatprep.subr.bf16.mxu0 %v1282_v27 }
  0xfd   : > { %1285 = vmatpush1.bf16.msra.mxu0 %v1284_v26 }
  0xfe   : > { %1409 = vset.pattern.permute.xlu1 %v1639_v47 }
  0xff   : > { %435 = vperm.xlu1 %1409, %v1833_v10  }
 0x100   : > { %1257 = vmatmul.mubr.msk.f32.vlgmr.msra.gmra.mrb[0].mxu0 %vm303_vm0, %v1809_v2  ;;  %v630_v28 = vpop.permute.xlu1 %629 }
 0x101   : > { %382 = vmatprep.mubr.f32.mxu0 %v1626_v6 }
 0x104   : > { %1258 = vmatmul.mubr.msk.f32.gmra.mrb[2].mxu0 %vm303_vm0, %v1813_v3 }
 0x105   : > { %388 = vmatprep.mubr.f32.mxu0 %v1626_v6 }
 0x108   : > { %1259 = vmatmul.mubr.msk.f32.gmra.mrb[4].mxu0 %vm303_vm0, %v1817_v4  ;;  %v517_v4 = vadd.f32 %v516_v32, %v515_v31 }
 0x109   : > { %394 = vmatprep.mubr.f32.mxu0 %v1626_v6 }
 0x10a   : > { %v533_v16 = vadd.f32 %v532_v36, %v517_v4 }
 0x10c   : > { %1260 = vmatmul.mubr.msk.f32.gmra.mrb[6].mxu0 %vm303_vm0, %v1819_v5  ;;  %v523_v5 = vmul.f32 %v521_v33, %v521_v33  ;;  %vm536_vm2 = vcmp.eq.f32.partialorder %v533_v16, inf  ;;  %v539_v46 = vand.u32 2147483648, %v533_v16  ;;  %vm538_vm4 = vcmp.eq.f32.partialorder %v533_v16, 0.0 }
 0x10d   : > { %955 = vmatprep.mubr.f32.mxu0 %v1626_v6 }
 0x10e   : > { %v524_v39 = vadd.f32 %v523_v5, %v517_v4 }
 0x110   : > { %1426 = vrsqrt.f32 %v524_v39  ;;  %vm527_vm1 = vcmp.eq.f32.partialorder %v524_v39, inf  ;;  %v530_v44 = vand.u32 2147483648, %v524_v39  ;;  %vm529_vm3 = vcmp.eq.f32.partialorder %v524_v39, 0.0 }
 0x111   : > { %1428 = vrsqrt.f32 %v533_v16 }
 0x11a   : > { %v1427_v3 = vpop.eup %1426 }
 0x11b   : > { %v1429_v42 = vpop.eup %1428  ;;  %v526_v43 = vmul.f32 %v1427_v3, %v524_v39  ;;  %v634_v3 = vpop.permute.xlu1 %633 }
 0x11c   : > { %v535_v2 = vmul.f32 %v1429_v42, %v533_v16 }
 0x11d   : > { %v528_v45 = vsel %vm527_vm1, %v524_v39, %v526_v43 }
 0x11e   : > { %v537_v48 = vsel %vm536_vm2, %v533_v16, %v535_v2  ;;  %v531_v49 = vsel %vm529_vm3, %v530_v44, %v528_v45 }
 0x11f   : > { %v540_v50 = vsel %vm538_vm4, %v539_v46, %v537_v48  ;;  %v541_v51 = vsub.f32 0.0, %v531_v49 }
 0x120   : > { %v544_v52 = vsub.f32 0.0, %v540_v50 }
 0x121   : > { %v542_v54 = vmul.f32 1.442695, %v541_v51 }
 0x122   : > { %v545_v55 = vmul.f32 1.442695, %v544_v52 }
 0x123   : > { %1430 = vpow2.f32 %v542_v54 }
 0x124   : > { %1432 = vpow2.f32 %v545_v55 }
 0x12d   : > { %v1899_v58 = vpop.eup %1430 }
 0x12e   : > { %v1901_v59 = vpop.eup %1432  ;;  %v552_v62 = vrot.slane %v1899_v58, %v1846_v14  ;;  %v556_v0 = vrot.slane %v1899_v58, %v1849_v15 }
 0x12f   : > { %v563_v63 = vrot.slane %v1901_v59, %v1846_v14  ;;  %v567_v1 = vrot.slane %v1901_v59, %v1849_v15 }
 0x130   : > { %v583_v7 = vrot.slane %v552_v62, %v1846_v14  ;;  %v587_v11 = vrot.slane %v556_v0, %v1846_v14 }
 0x131   : > { %v591_v8 = vrot.slane %v563_v63, %v1846_v14  ;;  %v595_v19 = vrot.slane %v567_v1, %v1846_v14 }
 0x132   : > { %v596_v22 = vmul.f32 %v583_v7, %v573_v9  ;;  %v597_v24 = vmul.f32 %v587_v11, %v573_v9  ;;  %v615_v26 = vmul.f32 %v606_v20, %v587_v11  ;;  %v601_v30 = vmul.f32 %v587_v11, %v578_v61 }
 0x133   : > { %v612_v21 = vmul.f32 %v606_v20, %v591_v8  ;;  %v613_v23 = vmul.f32 %v606_v20, %v595_v19  ;;  %v599_v27 = vmul.f32 %v595_v19, %v573_v9  ;;  %v617_v32 = vmul.f32 %v610_v25, %v595_v19 }
 0x134   : > { %v600_v33 = vmul.f32 %v583_v7, %v578_v61  ;;  %v616_v4 = vmul.f32 %v610_v25, %v591_v8  ;;  %v603_v5 = vmul.f32 %v595_v19, %v578_v61  ;;  %v619_v38 = vmul.f32 %v610_v25, %v587_v11 }
 0x135   : > { %v620_v29 = vadd.f32 %v612_v21, %v596_v22  ;;  %v621_v31 = vadd.f32 %v613_v23, %v597_v24  ;;  %v623_v34 = vadd.f32 %v615_v26, %v599_v27  ;;  %v625_v39 = vadd.f32 %v617_v32, %v601_v30 }
 0x136   : > { %v614_v41 = vmul.f32 %v606_v20, %v583_v7  ;;  %v598_v42 = vmul.f32 %v591_v8, %v573_v9  ;;  %v624_v46 = vadd.f32 %v616_v4, %v600_v33  ;;  %v627_v50 = vadd.f32 %v619_v38, %v603_v5 }
 0x137   : > { %v636_v35 = vadd.f32 %v630_v28, %v620_v29  ;;  %v637_v37 = vadd.f32 %v630_v28, %v621_v31  ;;  %v639_v44 = vadd.f32 %v630_v28, %v623_v34  ;;  %v641_v51 = vadd.f32 %v634_v3, %v625_v39 }
 0x138   : > { %v602_v52 = vmul.f32 %v591_v8, %v578_v61  ;;  %v618_v54 = vmul.f32 %v610_v25, %v583_v7  ;;  %v622_v63 = vadd.f32 %v614_v41, %v598_v42  ;;  %v640_v9 = vadd.f32 %v634_v3, %v624_v46 }
 0x139   : > { %v644_v45 = vmul.f32 0.5, %v636_v35  ;;  %v645_v48 = vmul.f32 0.5, %v637_v37  ;;  %v647_v1 = vmul.f32 0.5, %v639_v44  ;;  %v643_v19 = vadd.f32 %v634_v3, %v627_v50 }
 0x13a   : > { %v649_v20 = vmul.f32 0.5, %v641_v51  ;;  %v626_v22 = vadd.f32 %v618_v54, %v602_v52  ;;  %v648_v23 = vmul.f32 0.5, %v640_v9  ;;  %v638_v24 = vadd.f32 %v630_v28, %v622_v63 }
 0x13b   : > { %v651_v25 = vmul.f32 0.5, %v643_v19 }
 0x13c   : > { %v642_v29 = vadd.f32 %v634_v3, %v626_v22  ;;  %v646_v35 = vmul.f32 0.5, %v638_v24 }
 0x13e   : > { %v650_v5 = vmul.f32 0.5, %v642_v29 }
 0x1d3   : > { %v378_v36 = vpop.f32.mrb[0].mxu0 }
 0x1d4   : > { %v379_v16 = vadd.f32 %v378_v36, %v289_v53  ;;  %v380_v40 = vpop.f32.mrb[1].mxu0 }
 0x1d5   : > { %v381_v43 = vadd.f32 %v380_v40, %v289_v53 }
 0x1d6   : > { %v401_v2 = vmul.f32 0.5, %v379_v16 }
 0x1d7   : > { %v402_v47 = vmul.f32 0.5, %v381_v43  ;;  %v384_v49 = vpop.f32.mrb[2].mxu0 }
 0x1d8   : > { %1434 = vtanh.f32 %v401_v2  ;;  %v385_v55 = vadd.f32 %v384_v49, %v293_v60  ;;  %v386_v62 = vpop.f32.mrb[3].mxu0 }
 0x1d9   : > { %1436 = vtanh.f32 %v402_v47  ;;  %v387_v0 = vadd.f32 %v386_v62, %v293_v60 }
 0x1da   : > { %1438 = vtanh.f32 %v644_v45  ;;  %v403_v53 = vmul.f32 0.5, %v385_v55 }
 0x1db   : > { %1440 = vtanh.f32 %v645_v48  ;;  %v404_v11 = vmul.f32 0.5, %v387_v0  ;;  %v390_v21 = vpop.f32.mrb[4].mxu0 }
 0x1dc   : > { %1442 = vtanh.f32 %v403_v53  ;;  %v391_v61 = vadd.f32 %v390_v21, %v1895_v56  ;;  %v392_v8 = vpop.f32.mrb[5].mxu0 }
 0x1dd   : > { %1444 = vtanh.f32 %v404_v11  ;;  %v393_v7 = vadd.f32 %v392_v8, %v1895_v56 }
 0x1de   : > { %1446 = vtanh.f32 %v647_v1  ;;  %v405_v60 = vmul.f32 0.5, %v391_v61 }
 0x1df   : > { %1448 = vtanh.f32 %v649_v20  ;;  %v406_v26 = vmul.f32 0.5, %v393_v7  ;;  %v396_v27 = vpop.f32.mrb[6].mxu0 }
 0x1e0   : > { %1450 = vtanh.f32 %v405_v60  ;;  %v397_v30 = vadd.f32 %v396_v27, %v1897_v57  ;;  %v398_v31 = vpop.f32.mrb[7].mxu0 }
 0x1e1   : > { %1452 = vtanh.f32 %v406_v26  ;;  %v399_v32 = vadd.f32 %v398_v31, %v1897_v57 }
 0x1e2   : > { %v1435_v33 = vpop.eup %1434  ;;  %1454 = vtanh.f32 %v648_v23  ;;  %v407_v34 = vmul.f32 0.5, %v397_v30 }
 0x1e3   : > { %v1437_v56 = vpop.eup %1436  ;;  %1456 = vtanh.f32 %v651_v25  ;;  %v408_v4 = vmul.f32 0.5, %v399_v32  ;;  %v417_v37 = vadd.f32 1.0, %v1435_v33 }
 0x1e4   : > { %v1439_v28 = vpop.eup %1438  ;;  %1458 = vtanh.f32 %v407_v34  ;;  %v418_v39 = vadd.f32 1.0, %v1437_v56  ;;  %v439_v34 = vpop.permute.xlu0 %438 }
 0x1e5   : > { %v1441_v36 = vpop.eup %1440  ;;  %1460 = vtanh.f32 %v408_v4  ;;  %v425_v42 = vmul.f32 0.5, %v417_v37  ;;  %v660_v1 = vadd.f32 1.0, %v1439_v28 }
 0x1e6   : > { %v1443_v38 = vpop.eup %1442  ;;  %1462 = vtanh.f32 %v646_v35  ;;  %v426_v44 = vmul.f32 0.5, %v418_v39  ;;  %v661_v50 = vadd.f32 1.0, %v1441_v36 }
 0x1e7   : > { %v1445_v16 = vpop.eup %1444  ;;  %v419_v40 = vadd.f32 1.0, %v1443_v38  ;;  %1464 = vtanh.f32 %v650_v5  ;;  %v668_v29 = vmul.f32 0.5, %v660_v1  ;;  %v685_v5 = vpop.permute.xlu1 %684  ;;  %v1640_v38 = vmov 117  }
 0x1e8   : > { %v1447_v3 = vpop.eup %1446  ;;  %v420_v57 = vadd.f32 1.0, %v1445_v16  ;;  %v669_v9 = vmul.f32 0.5, %v661_v50  ;;  %v687_v37 = vpop.permute.xlu0 %686  ;;  %1408 = vset.pattern.permute.xlu0 %v1640_v38 }
 0x1e9   : > { %v1449_v41 = vpop.eup %1448  ;;  %v427_v43 = vmul.f32 0.5, %v419_v40  ;;  %v663_v22 = vadd.f32 1.0, %v1447_v3  ;;  %1004 = vperm.xlu0 %1408, %v1833_v10  }
 0x1ea   : > { %v1451_v2 = vpop.eup %1450  ;;  %v428_v45 = vmul.f32 0.5, %v420_v57  ;;  %v665_v62 = vadd.f32 1.0, %v1449_v41 }
 0x1eb   : > { %v1453_v46 = vpop.eup %1452  ;;  %v1288_v47 = vpack.c.bf16 %v427_v43, %v425_v42  ;;  %v421_v52 = vadd.f32 1.0, %v1451_v2  ;;  %v671_v32 = vmul.f32 0.5, %v663_v22  ;;  %v678_v39 = vpop.permute.xlu1 %677  ;;  %v1641_v42 = vmov 1966171168  }
 0x1ec   : > { %v1455_v48 = vpop.eup %1454  ;;  %v1286_v49 = vpack.c.bf16 %v428_v45, %v426_v44  ;;  %v422_v55 = vadd.f32 1.0, %v1453_v46  ;;  %v673_v23 = vmul.f32 0.5, %v665_v62  ;;  %v1109_v43 = vunpack.c.l.s4 %v1641_v42  ;;  %v682_v62 = vpop.permute.xlu0 %681 }
 0x1ed   : > { %v1457_v51 = vpop.eup %1456  ;;  %v664_v19 = vadd.f32 1.0, %v1455_v48  ;;  %v429_v20 = vmul.f32 0.5, %v421_v52 }
 0x1ee   : > { %v1459_v54 = vpop.eup %1458  ;;  %1287 = vmatprep.subr.bf16.mxu1 %v1286_v49  ;;  %v430_v8 = vmul.f32 0.5, %v422_v55  ;;  %v667_v60 = vadd.f32 1.0, %v1457_v51  ;;  %v1294_v31 = vpack.c.bf16 %v673_v23, %v669_v9  ;;  %v1110_v44 = vunpack.c.0.s8 %v1109_v43 }
 0x1ef   : > { %v1461_v63 = vpop.eup %1460  ;;  %v423_v0 = vadd.f32 1.0, %v1459_v54  ;;  %1289 = vmatpush1.bf16.msra.mxu1 %v1288_v47  ;;  %v672_v30 = vmul.f32 0.5, %v664_v19  ;;  %v964_v16 = vpop.permute.xlu1 %963 }
 0x1f0   : > { %v424_v53 = vadd.f32 1.0, %v1461_v63  ;;  %v1463_v11 = vpop.eup %1462  ;;  %v675_v33 = vmul.f32 0.5, %v667_v60  ;;  %v1935_v10 = vsub.s32 %v1110_v44, %v1843_v13  ;;  %v972_v13 = vmul.f32 %v964_v16, %v1860_v18 }
 0x1f1   : > { %v431_v21 = vmul.f32 0.5, %v423_v0  ;;  %v1465_v61 = vpop.eup %1464  ;;  %v662_v26 = vadd.f32 1.0, %v1463_v11  ;;  %v1296_v56 = vpack.c.bf16 %v672_v30, %v668_v29  ;;  %v971_v12 = vmul.f32 %v964_v16, %v1856_v17 }
 0x1f2   : > { %v432_v7 = vmul.f32 0.5, %v424_v53  ;;  %v666_v27 = vadd.f32 1.0, %v1465_v61  ;;  %v1298_v28 = vpack.c.bf16 %v675_v33, %v671_v32  ;;  %v977_v61 = vpop.permute.xlu0 %976 }
 0x1f3   : > { %v1292_v24 = vpack.c.bf16 %v431_v21, %v429_v20  ;;  %v670_v35 = vmul.f32 0.5, %v662_v26  ;;  %v969_v40 = vpop.permute.xlu1 %968  ;;  %v983_v32 = vadd.f32 %v977_v61, %v971_v12 }
 0x1f4   : > { %v1290_v25 = vpack.c.bf16 %v432_v7, %v430_v8  ;;  %v674_v4 = vmul.f32 0.5, %v666_v27  ;;  %v973_v45 = vmul.f32 %v969_v40, %v1856_v17  ;;  %v974_v1 = vmul.f32 %v969_v40, %v1860_v18 }
 0x1f6   : > { %1291 = vmatprep.subr.bf16.mxu1 %v1290_v25  ;;  %v1300_v36 = vpack.c.bf16 %v674_v4, %v670_v35  ;;  %v984_v25 = vadd.f32 %v977_v61, %v972_v13 }
 0x1f7   : > { %1293 = vmatpush1.bf16.msra.mxu1 %v1292_v24  ;;  %v981_v3 = vpop.permute.xlu1 %980 }
 0x1f8   : > { %1295 = vmatprep.subr.bf16.mxu1 %v1294_v31  ;;  %v985_v50 = vadd.f32 %v981_v3, %v973_v45  ;;  %v986_v23 = vadd.f32 %v981_v3, %v974_v1 }
 0x1fa   : > { %1261 = vmatmul.mubr.msk.f32.vlgmr.msra.gmra.mrb[0].mxu1 %vm303_vm0, %v439_v34  ;;  %v989_v9 = vmul.f32 0.5, %v985_v50  ;;  %v990_v30 = vmul.f32 0.5, %v986_v23 }
 0x1fb   : > { %1297 = vmatpush1.bf16.msra.mxu1 %v1296_v56  ;;  %757 = vmatprep.mubr.f32.mxu1 %v1626_v6  ;;  %v1929_v57 = vpop.permute.xlu1 %887  ;;  %v988_v56 = vmul.f32 0.5, %v984_v25 }
 0x1fc   : > { %1299 = vmatprep.subr.bf16.mxu1 %v1298_v28  ;;  %1466 = vtanh.f32 %v989_v9 }
 0x1fe   : > { %1262 = vmatmul.mubr.msk.f32.vlgmr.msra.gmra.mrb[2].mxu1 %vm688_vm5, %v685_v5 }
 0x1ff   : > { %1301 = vmatpush1.bf16.msra.mxu1 %v1300_v36  ;;  %763 = vmatprep.mubr.f32.mxu1 %v1626_v6  ;;  %v1931_v41 = vpop.permute.xlu1 %884 }
 0x202   : > { %1263 = vmatmul.mubr.msk.f32.gmra.mrb[4].mxu1 %vm688_vm5, %v687_v37 }
 0x203   : > { %834 = vmatprep.mubr.f32.mxu1 %v1626_v6  ;;  %v436_v2 = vpop.permute.xlu1 %435 }
 0x206   : > { %1264 = vmatmul.mubr.msk.f32.vlgmr.msra.gmra.mrb[6].mxu1 %vm688_vm5, %v685_v5  ;;  %v987_v5 = vmul.f32 0.5, %v983_v32 }
 0x207   : > { %840 = vmatprep.mubr.f32.mxu1 %v1626_v6 }
 0x20a   : > { %1265 = vmatmul.mubr.msk.f32.gmra.mrb[8].mxu1 %vm688_vm5, %v687_v37  ;;  %v1467_v37 = vpop.eup %1466 }
 0x2cd   : > { %v508_v46 = vpop.f32.mrb[0].mxu1 }
 0x2ce   : > { %v509_v47 = vadd.f32 %v508_v46, %v436_v2  ;;  %v510_v48 = vpop.f32.mrb[1].mxu1 }
 0x2cf   : > { %v511_v49 = vadd.f32 %v510_v48, %v436_v2 }
 0x2d1   : > { %v1130_v51 = vcombine.low %v509_v47, %v511_v49  ;;  %v759_v52 = vpop.f32.mrb[2].mxu1 }
 0x2d2   : > { %v760_v54 = vadd.f32 %v759_v52, %v678_v39  ;;  %v761_v55 = vpop.f32.mrb[3].mxu1 }
 0x2d3   : > { %v1137_v63 = vrot.slane %v1130_v51, %v1935_v10  ;;  %v762_v0 = vadd.f32 %v761_v55, %v678_v39 }
 0x2d4   : > { %v847_v20 = vmul.f32 0.5, %v760_v54 }
 0x2d5   : > { %v1144_v11 = vrot.slane %v1137_v63, %v1935_v10  ;;  %v765_v19 = vpop.f32.mrb[4].mxu1  ;;  %v848_v8 = vmul.f32 0.5, %v762_v0 }
 0x2d6   : > { %v766_v21 = vadd.f32 %v765_v19, %v682_v62  ;;  %v767_v22 = vpop.f32.mrb[5].mxu1  ;;  %1468 = vtanh.f32 %v847_v20 }
 0x2d7   : > { %v768_v7 = vadd.f32 %v767_v22, %v682_v62  ;;  %1270 = vst.msk [vmem:[%s1947_s28 + $0x1] ss:$2 sm:$0x3] %vm1941_vm6, %v1144_v11  ;;  %1470 = vtanh.f32 %v848_v8  ;;  %v997_v8 = vadd.f32 1.0, %v1467_v37 }
 0x2d8   : > { %v851_v18 = vmul.f32 0.5, %v766_v21 }
 0x2d9   : > { %v852_v60 = vmul.f32 0.5, %v768_v7  ;;  %v836_v24 = vpop.f32.mrb[6].mxu1 }
 0x2da   : > { %v837_v26 = vadd.f32 %v836_v24, %v678_v39  ;;  %v838_v27 = vpop.f32.mrb[7].mxu1  ;;  %1472 = vtanh.f32 %v851_v18 }
 0x2db   : > { %v839_v29 = vadd.f32 %v838_v27, %v678_v39  ;;  %1474 = vtanh.f32 %v852_v60 }
 0x2dc   : > { %v849_v31 = vmul.f32 0.5, %v837_v26  ;;  %v1001_v26 = vmul.f32 0.5, %v997_v8 }
 0x2dd   : > { %v850_v33 = vmul.f32 0.5, %v839_v29  ;;  %v842_v34 = vpop.f32.mrb[8].mxu1 }
 0x2de   : > { %1476 = vtanh.f32 %v849_v31  ;;  %v843_v17 = vadd.f32 %v842_v34, %v682_v62  ;;  %v844_v35 = vpop.f32.mrb[9].mxu1  ;;  %v1008_v31 = vpop.permute.xlu0 %1007  ;;  %v547_v34 = vadd.f32 %v1901_v59, %v1899_v58 }
 0x2df   : > { %1478 = vtanh.f32 %v850_v33  ;;  %v845_v4 = vadd.f32 %v844_v35, %v682_v62 }
 0x2e0   : > { %1480 = vtanh.f32 %v990_v30  ;;  %v853_v28 = vmul.f32 0.5, %v843_v17  ;;  %v1469_v38 = vpop.eup %1468 }
 0x2e1   : > { %v854_v36 = vmul.f32 0.5, %v845_v4  ;;  %1482 = vtanh.f32 %v988_v56  ;;  %v1471_v39 = vpop.eup %1470  ;;  %v863_v3 = vadd.f32 1.0, %v1469_v38 }
 0x2e2   : > { %1484 = vtanh.f32 %v853_v28  ;;  %v864_v43 = vadd.f32 1.0, %v1471_v39  ;;  %v1005_v56 = vpop.permute.xlu0 %1004 }
 0x2e3   : > { %1486 = vtanh.f32 %v854_v36  ;;  %v871_v48 = vmul.f32 0.5, %v863_v3  ;;  %v1100_v36 = vrot.slane %v547_v34, %v1849_v15 }
 0x2e4   : > { %1488 = vtanh.f32 %v987_v5  ;;  %v1473_v16 = vpop.eup %1472  ;;  %v872_v52 = vmul.f32 0.5, %v864_v43 }
 0x2e5   : > { %v1475_v40 = vpop.eup %1474  ;;  %v867_v49 = vadd.f32 1.0, %v1473_v16 }
 0x2e6   : > { %v868_v54 = vadd.f32 1.0, %v1475_v40 }
 0x2e7   : > { %v875_v20 = vmul.f32 0.5, %v867_v49 }
 0x2e8   : > { %v1477_v42 = vpop.eup %1476  ;;  %v876_v22 = vmul.f32 0.5, %v868_v54 }
 0x2e9   : > { %v1479_v2 = vpop.eup %1478  ;;  %v865_v44 = vadd.f32 1.0, %v1477_v42 }
 0x2ea   : > { %v1481_v45 = vpop.eup %1480  ;;  %v866_v46 = vadd.f32 1.0, %v1479_v2 }
 0x2eb   : > { %v1483_v47 = vpop.eup %1482  ;;  %v873_v50 = vmul.f32 0.5, %v865_v44  ;;  %v998_v63 = vadd.f32 1.0, %v1481_v45 }
 0x2ec   : > { %v1485_v51 = vpop.eup %1484  ;;  %v874_v55 = vmul.f32 0.5, %v866_v46  ;;  %v996_v11 = vadd.f32 1.0, %v1483_v47 }
 0x2ed   : > { %v1487_v62 = vpop.eup %1486  ;;  %v879_v0 = vadd.f32 %v873_v50, %v871_v48  ;;  %v869_v1 = vadd.f32 1.0, %v1485_v51  ;;  %v1002_v7 = vmul.f32 0.5, %v998_v63 }
 0x2ee   : > { %v1489_v13 = vpop.eup %1488  ;;  %v870_v9 = vadd.f32 1.0, %v1487_v62  ;;  %v880_v19 = vadd.f32 %v874_v55, %v872_v52  ;;  %v1000_v18 = vmul.f32 0.5, %v996_v11 }
 0x2ef   : > { %v877_v21 = vmul.f32 0.5, %v869_v1  ;;  %v995_v23 = vadd.f32 1.0, %v1489_v13 }
 0x2f0   : > { %v878_v61 = vmul.f32 0.5, %v870_v9  ;;  %v1306_v29 = vpack.c.bf16 %v1002_v7, %v1000_v18 }
 0x2f1   : > { %v881_v12 = vadd.f32 %v877_v21, %v875_v20  ;;  %v999_v27 = vmul.f32 0.5, %v995_v23 }
 0x2f2   : > { %v882_v60 = vadd.f32 %v878_v61, %v876_v22 }
 0x2f3   : > { %v1304_v24 = vpack.c.bf16 %v881_v12, %v879_v0  ;;  %v1309_v30 = vpack.c.bf16 %v1001_v26, %v999_v27 }
 0x2f4   : > { %v1302_v25 = vpack.c.bf16 %v882_v60, %v880_v19 }
 0x2f6   : > { %1303 = vmatprep.subr.bf16.mxu0 %v1302_v25 }
 0x2f7   : > { %1305 = vmatpush1.bf16.msra.mxu0 %v1304_v24 }
 0x2f8   : > { %1308 = vmatprep.subr.msk.bf16.mxu0 %vm1307_vm9, %v1306_v29 }
 0x2fa   : > { %1266 = vmatmul.mubr.msk.f32.vlgmr.msra.gmra.mrb[8].mxu0 %vm688_vm5, %v1929_v57  ;;  %v1096_v57 = vrot.slane %v547_v34, %v1846_v14 }
 0x2fb   : > { %1311 = vmatpush1.bf16.msk.msra.mxu0 %vm1307_vm9, %v1309_v30  ;;  %1083 = vmatprep.mubr.f32.mxu0 %v1626_v6 }
 0x2fe   : > { %1269 = vmatmul.mubr.msk.f32.vlgmr.msra.gmra.mrb[10].mxu0 %vm1009_vm10, %v1008_v31 }
 0x3cd   : > { %v957_v32 = vpop.f32.mrb[8].mxu0 }
 0x3ce   : > { %v959_v33 = vpop.f32.mrb[9].mxu0  ;;  %v958_v35 = vadd.f32 %v957_v32, %v1931_v41 }
 0x3cf   : > { %v960_v6 = vadd.f32 %v959_v33, %v1931_v41 }
 0x3d1   : > { %v1085_v17 = vpop.f32.mrb[10].mxu0 }
 0x3d2   : > { %v1086_v4 = vadd.f32 %v1085_v17, %v1005_v56  ;;  %v1087_v28 = vpop.f32.mrb[11].mxu0 }
 0x3d3   : > { %v1088_v5 = vadd.f32 %v1087_v28, %v1005_v56 }
 0x3d4   : > { %v1090_v37 = vmul.f32 %v1086_v4, %v958_v35 }
 0x3d5   : > { %v1091_v38 = vmul.f32 %v1088_v5, %v960_v6 }
 0x3d6   : > { %v1103_v58 = vadd.f32 %v1096_v57, %v1090_v37 }
 0x3d7   : > { %v1104_v59 = vadd.f32 %v1100_v36, %v1091_v38 }
 0x3d9   : > { %v1107_v39 = vcombine.low %v1103_v58, %v1104_v59 }
 0x3db   : > { %v1114_v16 = vrot.slane %v1107_v39, %v1935_v10 }
 0x3dd   : > { %v1121_v14 = vrot.slane %v1114_v16, %v1935_v10 }
 0x3df   : > { %1127 = vst.msk [vmem:[%s1947_s28] ss:$2 sm:$0x3] %vm1941_vm6, %v1121_v14 }
 0x3e0   : > { %1561 = shalt.err (!%p1558_p7)
}
 0x3e1   : > { %s1562_s20 = scalar_lea.hbm %s1969_s6, 64  ;;  %s1566_s29 = scalar_lea.hbm %s2018_s2, 128 }
 0x3e2   : > { %p1563_p9 = scmp.ne.s32.totalorder %s1969_s6, %s1562_s20  ;;  %p1567_p0 = scmp.lt.u32.totalorder %s1969_s6, %s2018_s2 }
 0x3e3   : > { %p1568_p11 = scmp.lt.u32.totalorder %s1566_s29, %s1562_s20  ;;  %p1570_p4 = scmp.lt.u32.totalorder %s1562_s20, %s1969_s6 }
 0x3e4   : > { %p1564_p2 = pnand %p1563_p9, %p1750_p12 }
 0x3e5   : > { %p1569_p1 = por %p1568_p11, %p1567_p0 }
 0x3e6   : > { %p1565_p5 = pneg %p1564_p2 }
 0x3e7   : > { %p1571_p6 = por %p1570_p4, %p1569_p1 }
 0x3e9   : > { %p1572_p8 = pnand %p1571_p6, %p1565_p5 }
 0x3eb   : > { %1575 = shalt.err (!%p1572_p8)
}
 0x3ec   : > { %1318 = dma.vmem_to_hbm [thread:$0]  (%p1750_p12), %s1971_s3, 64, %s1969_s6, %s1149_s7  }
 0x3ed PF: > { %s1175_s27 = sand.u32 1, %s1606_s9   ;;  %p2035_p10 = scmp.ne.s32.totalorder %s2023_s16, 0 }
 0x3ee   : > { %p2036_p13 = scmp.ge.s32.totalorder %s1618_s12, 2  ;;  %s1176_s22 = scalar_lea.sflag [#allocation4], %s1175_s27 }
 0x3f0   : > { %p1329_p3 = pnand %p2036_p13, %p2035_p10 }
 0x3f2   : > { %1601 = dma.done.wait (!%p1329_p3), %s1176_s22, 64  }
 0x3f3   : > { %1603 = vsyncadd (!%p1329_p3), %s1176_s22, 4294967232  ;;  %p16_p7 = scmp.ge.s32.totalorder %s1715_s21, 4   ;;  %s2037_s9 = smov %s1610_s10 }
 0x3f4   : > { %s2038_s10 = smov %s1614_s11  ;;  %s2039_s11 = smov %s1746_s8 }
 0x3f5   : > { %s2040_s12 = smov %s1715_s21  ;;  %18 = sbr.rel (!%p16_p7) target bundleno = 6 (0x6), region = 81 }
 0x3fc   :  { %1181 = vsyncpa [#allocation3], 1 }
 0x3fd   :  { %1183 = vsyncpa [#allocation3 + $0x1], 1 }
 0x3fe   :  { %1184 = vsyncpa [#allocation6], 1 }
 0x3ff   :  { %1185 = vsyncpa [#allocation4], 1 }
 0x400   :  { %1187 = vsyncpa [#allocation4 + $0x1], 1 }

</bundles_post_ra>
